<compile_context>
chip_gen: v7x
topology: tpu7x:2x2x1
jax: 0.10.0
libtpu: 0.0.40
codegen_flags: <defaults>
</compile_context>

<pallas_src>
import functools

import numpy as np
import jax
import jax.numpy as jnp
from jax import lax
from jax.experimental import pallas as pl
from jax.experimental.pallas import tpu as pltpu

PAD = 0  # Constants.PAD


def get_sinusoid_encoding_table(n_position, d_hid, padding_idx=None):
    """Sinusoid position encoding table (same math as the PyTorch reference)."""

    def cal_angle(position, hid_idx):
        return position / np.power(10000, 2 * (hid_idx // 2) / d_hid)

    def get_posi_angle_vec(position):
        return [cal_angle(position, hid_j) for hid_j in range(d_hid)]

    sinusoid_table = np.array(
        [get_posi_angle_vec(pos_i) for pos_i in range(n_position)]
    )
    sinusoid_table[:, 0::2] = np.sin(sinusoid_table[:, 0::2])
    sinusoid_table[:, 1::2] = np.cos(sinusoid_table[:, 1::2])
    if padding_idx is not None:
        sinusoid_table[padding_idx] = 0.0
    return jnp.asarray(sinusoid_table, dtype=jnp.float32)


def _onehot_embed_kernel(seq_ids_ref, pos_ids_ref, word_tab_ref, pos_tab_ref,
                         out_ref):
    """Fully vectorized path: both gathers are one-hot MXU matmuls.

    seq_ids_ref / pos_ids_ref : VMEM (1, tq, 1) int32   (per-tile ids)
    word_tab_ref              : VMEM (V, D) f32         (resident, 1-buffered)
    pos_tab_ref               : VMEM (P, D) f32         (resident, 1-buffered)
    out_ref                   : VMEM (tq, D) f32
    """
    tq = out_ref.shape[0]
    V = word_tab_ref.shape[0]
    P = pos_tab_ref.shape[0]

    tok_ids = seq_ids_ref[0]            # (tq, 1) int32
    pos_ids = pos_ids_ref[0]            # (tq, 1) int32

    tok_oh = (lax.broadcasted_iota(jnp.int32, (tq, V), 1)
              == tok_ids).astype(word_tab_ref.dtype)
    pos_oh = (lax.broadcasted_iota(jnp.int32, (tq, P), 1)
              == pos_ids).astype(pos_tab_ref.dtype)

    acc = jnp.dot(tok_oh, word_tab_ref[...], preferred_element_type=jnp.float32)
    acc = acc + jnp.dot(pos_oh, pos_tab_ref[...],
                        preferred_element_type=jnp.float32)
    out_ref[...] = acc.astype(out_ref.dtype)


def _gather_embed_kernel(seq_sm_ref, pos_ids_ref, word_tab_ref, pos_tab_ref,
                         out_ref, stage_ref, *, tq, rows=8):
    """Large-vocab fallback: batched, unrolled word-row gathers + dense stores.

    seq_sm_ref  : SMEM (n_pad,) int32     (scalar-prefetched token ids)
    pos_ids_ref : VMEM (1, tq, 1) int32
    word_tab_ref: VMEM (V, D) f32 (resident, single-buffered)
    pos_tab_ref : VMEM (P, D) f32 (resident, single-buffered)
    stage_ref   : VMEM (rows, D) f32 staging block
    """
    base = pl.program_id(0) * tq
    P, D = pos_tab_ref.shape

    pos_oh = (lax.broadcasted_iota(jnp.int32, (tq, P), 1)
              == pos_ids_ref[0]).astype(pos_tab_ref.dtype)
    pos_contrib = jnp.dot(pos_oh, pos_tab_ref[...],
                          preferred_element_type=jnp.float32)

    def group(g, carry):
        row0 = g * rows

        def one_row(j, c):
            tok = seq_sm_ref[base + row0 + j]
            stage_ref[pl.ds(j, 1), :] = word_tab_ref[pl.ds(tok, 1), :]
            return c

        lax.fori_loop(0, rows, one_row, 0, unroll=True)
        pos_blk = lax.dynamic_slice(pos_contrib, (row0, 0), (rows, D))
        out_ref[pl.ds(row0, rows), :] = (stage_ref[...] + pos_blk
                                         ).astype(out_ref.dtype)
        return carry

    lax.fori_loop(0, tq // rows, group, 0)


def _pick_tile(n_tokens, max_tq=512):
    """Prefer the largest multiple-of-8 tile that divides n_tokens (no output
    padding -> no extra HBM copy); otherwise fall back to a padded tiling."""
    best = 0
    t = 8
    limit = min(max_tq, n_tokens)
    while t <= limit:
        if n_tokens % t == 0:
            best = t
        t += 8
    if best:
        return best, n_tokens
    tq = max(8, min(max_tq, ((n_tokens + 7) // 8) * 8))
    tq = (tq // 8) * 8
    n_tiles = -(-n_tokens // tq)
    return tq, n_tiles * tq


def only_embed_forward(src_seq, src_pos, word_emb_table, pos_enc_table,
                       *, max_tq=512, onehot_max_vocab=1024):
    """src_seq, src_pos: (B, L) int32.  Returns (B, L, D) float32."""
    B, L = src_seq.shape
    V, D = word_emb_table.shape
    P = pos_enc_table.shape[0]
    N = B * L

    tq, n_pad = _pick_tile(N, max_tq)
    n_tiles = n_pad // tq

    seq_flat = src_seq.reshape(N).astype(jnp.int32)
    pos_flat = src_pos.reshape(N).astype(jnp.int32)
    if n_pad != N:
        pad = n_pad - N
        # Padded tokens/positions point at row 0 (the zeroed PAD row); the
        # padded output rows are sliced off below.
        seq_flat = jnp.concatenate([seq_flat, jnp.zeros((pad,), jnp.int32)])
        pos_flat = jnp.concatenate([pos_flat, jnp.zeros((pad,), jnp.int32)])

    seq_ids = seq_flat.reshape(n_tiles, tq, 1)
    pos_ids = pos_flat.reshape(n_tiles, tq, 1)

    # ---- VMEM budget: buffer-count-aware, always set explicitly. ----------
    itemsize = 4
    table_bytes = (V + P) * D * itemsize          # single-buffered tables
    id_bytes = 2 * 2 * tq * itemsize              # two id blocks, double-buffered
    out_bytes = 2 * tq * D * itemsize             # output tile, double-buffered
    stage_bytes = 8 * D * itemsize
    onehot_bytes = tq * (V + P) * itemsize        # transient one-hot operands
    vmem_needed = (table_bytes + id_bytes + out_bytes + stage_bytes
                   + onehot_bytes + (2 << 20))
    vmem_limit = int(min(max(vmem_needed, 32 << 20), 120 << 20))

    use_onehot = V <= onehot_max_vocab

    cost = pl.CostEstimate(
        flops=(2 * n_pad * (V + P) * D) if use_onehot else (2 * n_pad * P * D),
        transcendentals=0,
        bytes_accessed=2 * n_pad * itemsize + table_bytes + n_pad * D * itemsize,
    )
    compiler_params = pltpu.CompilerParams(
        dimension_semantics=("parallel",),   # tiles independent; v7x: 2 TCs
        vmem_limit_bytes=vmem_limit,
    )

    if use_onehot:
        grid_spec = pltpu.PrefetchScalarGridSpec(
            num_scalar_prefetch=0,
            grid=(n_tiles,),
            in_specs=[
                pl.BlockSpec((1, tq, 1), lambda i: (i, 0, 0)),
                pl.BlockSpec((1, tq, 1), lambda i: (i, 0, 0)),
                pl.BlockSpec((V, D), lambda i: (0, 0),
                             pipeline_mode=pl.Buffered(1)),
                pl.BlockSpec((P, D), lambda i: (0, 0),
                             pipeline_mode=pl.Buffered(1)),
            ],
            out_specs=pl.BlockSpec((tq, D), lambda i: (i, 0)),
        )
        out_flat = pl.pallas_call(
            _onehot_embed_kernel,
            out_shape=jax.ShapeDtypeStruct((n_pad, D), jnp.float32),
            grid_spec=grid_spec,
            compiler_params=compiler_params,
            cost_estimate=cost,
        )(seq_ids, pos_ids, word_emb_table, pos_enc_table)
    else:
        kernel = functools.partial(_gather_embed_kernel, tq=tq)
        grid_spec = pltpu.PrefetchScalarGridSpec(
            num_scalar_prefetch=1,           # token ids -> SMEM for row gather
            grid=(n_tiles,),
            in_specs=[
                pl.BlockSpec((1, tq, 1), lambda i, seq_sm: (i, 0, 0)),
                pl.BlockSpec((V, D), lambda i, seq_sm: (0, 0),
                             pipeline_mode=pl.Buffered(1)),
                pl.BlockSpec((P, D), lambda i, seq_sm: (0, 0),
                             pipeline_mode=pl.Buffered(1)),
            ],
            out_specs=pl.BlockSpec((tq, D), lambda i, seq_sm: (i, 0)),
            scratch_shapes=[pltpu.VMEM((8, D), jnp.float32)],
        )
        out_flat = pl.pallas_call(
            kernel,
            out_shape=jax.ShapeDtypeStruct((n_pad, D), jnp.float32),
            grid_spec=grid_spec,
            compiler_params=compiler_params,
            cost_estimate=cost,
        )(seq_flat, pos_ids, word_emb_table, pos_enc_table)

    if n_pad != N:
        out_flat = out_flat[:N]
    return out_flat.reshape(B, L, D)


if __name__ == "__main__":
    # Small shapes consistent with the module's forward.
    n_src_vocab = 32
    len_max_seq = 8
    d_word_vec = 32
    B, L = 2, len_max_seq
    n_position = len_max_seq + 1

    key = jax.random.PRNGKey(0)
    k_emb, k_seq = jax.random.split(key)

    # Deterministic word embedding; padding_idx=PAD row zeroed (as nn.Embedding does).
    word_emb_table = jax.random.normal(
        k_emb, (n_src_vocab, d_word_vec), dtype=jnp.float32
    )
    word_emb_table = word_emb_table.at[PAD].set(0.0)

    # Frozen sinusoid positional table with padding_idx=0 zeroed.
    pos_enc_table = get_sinusoid_encoding_table(n_position, d_word_vec, padding_idx=0)

    # Example token ids (avoid 0 so positions are non-pad) and positions 1..L.
    src_seq = jax.random.randint(k_seq, (B, L), 1, n_src_vocab, dtype=jnp.int32)
    src_pos = jnp.tile(jnp.arange(1, L + 1, dtype=jnp.int32)[None, :], (B, 1))

    enc_output = only_embed_forward(src_seq, src_pos, word_emb_table, pos_enc_table)
    enc_output = jax.block_until_ready(enc_output)

    # Reference check in plain JAX (embedding lookup + add).
    ref = word_emb_table[src_seq] + pos_enc_table[src_pos]
    assert enc_output.shape == (B, L, d_word_vec)
    np.testing.assert_allclose(
        np.asarray(enc_output), np.asarray(ref), rtol=1e-6, atol=1e-6
    )

    print("KERNEL_OK")
</pallas_src>

<mosaic_0001>
module attributes {stable_mosaic.version = 11 : i64} {
  func.func @_onehot_embed_kernel(%arg0: i32, %arg1: memref<1x16x1xi32, #tpu.memory_space<vmem>>, %arg2: memref<1x16x1xi32, #tpu.memory_space<vmem>>, %arg3: memref<32x32xf32, #tpu.memory_space<vmem>>, %arg4: memref<9x32xf32, #tpu.memory_space<vmem>>, %arg5: memref<16x32xf32, #tpu.memory_space<vmem>>) attributes {dimension_semantics = [#tpu.dimension_semantics<parallel>], iteration_bounds = array<i64: 1>, scalar_prefetch = 0 : i64, scratch_operands = 0 : i64, tpu.core_type = #tpu.core_type<tc>, window_params = [{transform_indices = @transform_0, window_bounds = array<i64: 1, 16, 1>}, {transform_indices = @transform_1, window_bounds = array<i64: 1, 16, 1>}, {pipeline_mode = #tpu.pipeline_mode<synchronous>, transform_indices = @transform_2, window_bounds = array<i64: 32, 32>}, {pipeline_mode = #tpu.pipeline_mode<synchronous>, transform_indices = @transform_3, window_bounds = array<i64: 9, 32>}, {transform_indices = @transform_4, window_bounds = array<i64: 16, 32>}]} {
    %c0 = arith.constant 0 : index
    %c0_0 = arith.constant 0 : index
    %c0_1 = arith.constant 0 : index
    %0 = vector.load %arg1[%c0, %c0_0, %c0_1] : memref<1x16x1xi32, #tpu.memory_space<vmem>>, vector<1x16x1xi32>
    %1 = vector.shape_cast %0 : vector<1x16x1xi32> to vector<16x1xi32>
    %c0_2 = arith.constant 0 : index
    %c0_3 = arith.constant 0 : index
    %c0_4 = arith.constant 0 : index
    %2 = vector.load %arg2[%c0_2, %c0_3, %c0_4] : memref<1x16x1xi32, #tpu.memory_space<vmem>>, vector<1x16x1xi32>
    %3 = vector.shape_cast %2 : vector<1x16x1xi32> to vector<16x1xi32>
    %4 = tpu.iota {dimensions = array<i32: 1>} : vector<16x32xi32>
    %5 = vector.broadcast %1 : vector<16x1xi32> to vector<16x32xi32>
    %6 = arith.cmpi eq, %4, %5 : vector<16x32xi32>
    %7 = arith.extui %6 : vector<16x32xi1> to vector<16x32xi32>
    %8 = arith.sitofp %7 : vector<16x32xi32> to vector<16x32xf32>
    %9 = tpu.iota {dimensions = array<i32: 1>} : vector<16x9xi32>
    %10 = vector.broadcast %3 : vector<16x1xi32> to vector<16x9xi32>
    %11 = arith.cmpi eq, %9, %10 : vector<16x9xi32>
    %12 = arith.extui %11 : vector<16x9xi1> to vector<16x9xi32>
    %13 = arith.sitofp %12 : vector<16x9xi32> to vector<16x9xf32>
    %c0_5 = arith.constant 0 : index
    %c0_6 = arith.constant 0 : index
    %14 = vector.load %arg3[%c0_5, %c0_6] : memref<32x32xf32, #tpu.memory_space<vmem>>, vector<32x32xf32>
    %cst = arith.constant dense<0.000000e+00> : vector<16x32xf32>
    %15 = tpu.matmul %8, %14, %cst {dimension_numbers = #tpu.dot_dimension_numbers<[1], [0], [0], [1], [0, 0, 1, 1], [], []>} : vector<16x32xf32>, vector<32x32xf32>, vector<16x32xf32> -> vector<16x32xf32>
    %c0_7 = arith.constant 0 : index
    %c0_8 = arith.constant 0 : index
    %16 = vector.load %arg4[%c0_7, %c0_8] : memref<9x32xf32, #tpu.memory_space<vmem>>, vector<9x32xf32>
    %cst_9 = arith.constant dense<0.000000e+00> : vector<16x32xf32>
    %17 = tpu.matmul %13, %16, %cst_9 {dimension_numbers = #tpu.dot_dimension_numbers<[1], [0], [0], [1], [0, 0, 1, 1], [], []>} : vector<16x9xf32>, vector<9x32xf32>, vector<16x32xf32> -> vector<16x32xf32>
    %18 = arith.addf %15, %17 : vector<16x32xf32>
    %c0_10 = arith.constant 0 : index
    %c0_11 = arith.constant 0 : index
    %19 = vector.load %arg5[%c0_10, %c0_11] : memref<16x32xf32, #tpu.memory_space<vmem>>, vector<16x32xf32>
    tpu.vector_store %arg5[%c0_10, %c0_11], %18 {strides = array<i32>} : memref<16x32xf32, #tpu.memory_space<vmem>>, vector<16x32xf32>,
    return
  }
  func.func @transform_0(%arg0: i32) -> (i32, i32, i32) {
    %c0_i32 = arith.constant 0 : i32
    %c0_i32_0 = arith.constant 0 : i32
    %c0_i32_1 = arith.constant 0 : i32
    return %arg0, %c0_i32, %c0_i32_0 : i32, i32, i32
  }
  func.func @transform_1(%arg0: i32) -> (i32, i32, i32) {
    %c0_i32 = arith.constant 0 : i32
    %c0_i32_0 = arith.constant 0 : i32
    %c0_i32_1 = arith.constant 0 : i32
    return %arg0, %c0_i32, %c0_i32_0 : i32, i32, i32
  }
  func.func @transform_2(%arg0: i32) -> (i32, i32) {
    %c0_i32 = arith.constant 0 : i32
    %c0_i32_0 = arith.constant 0 : i32
    %c0_i32_1 = arith.constant 0 : i32
    return %c0_i32, %c0_i32_0 : i32, i32
  }
  func.func @transform_3(%arg0: i32) -> (i32, i32) {
    %c0_i32 = arith.constant 0 : i32
    %c0_i32_0 = arith.constant 0 : i32
    %c0_i32_1 = arith.constant 0 : i32
    return %c0_i32, %c0_i32_0 : i32, i32
  }
  func.func @transform_4(%arg0: i32) -> (i32, i32) {
    %c0_i32 = arith.constant 0 : i32
    %c0_i32_0 = arith.constant 0 : i32
    return %arg0, %c0_i32 : i32, i32
  }
}

</mosaic_0001>

<bundles_post_ra>
// kernel: tpu_custom_call.1
= control target key start
LH: loop header
LB: loop body
LE: loop exit
PB: predicated region body
PF: predicated region fallthrough
CT: control target
= control target key end

     0   :  { %9 = vsyncpa [#allocation3], 0  ;;  %s455_s0 = inlined_call_operand.vmem [shape: s32[1,16,1], index: 0, kind: input, shape index: {}]   ;;  %s456_s1 = inlined_call_operand.vmem [shape: s32[1,16,1], index: 1, kind: input, shape index: {}]   ;;  %s457_s2 = inlined_call_operand.vmem [shape: f32[32,32], index: 2, kind: input, shape index: {}]   ;;  %s458_s3 = inlined_call_operand.hbm [shape: f32[9,32], index: 3, kind: input, shape index: {}]   ;;  %s459_s4 = inlined_call_operand.hbm [shape: f32[16,32], index: 4, kind: output, shape index: {}]  }
   0x1   :  { %10 = vsyncpa [#allocation4], 0  ;;  %s365_s15 = smov [#allocation2]   ;;  %s317_s19 = scalar_lea.hbm %s458_s3, 256 }
   0x2   :  { %s22_s16 = sshll.u32 %s365_s15, 4  ;;  %p318_p0 = scmp.ne.s32.totalorder %s458_s3, %s317_s19  ;;  %s23_s16 = int_to_ptr.vmem [resolvable:$true] %s22_s16 }
   0x3   :  { %p321_p1 = scmp.lt.u32.totalorder %s317_s19, %s458_s3 }
   0x5   :  { %p323_p2 = pnand %p321_p1, %p318_p0 }
   0x7   :  { %326 = shalt.err (!%p323_p2)
}
   0x8   :  { %s327_s24 = scalar_lea.vmem %s23_s16, 256  ;;  %p332_p4 = scmp.lt.s32.totalorder %s23_s16, %s23_s16 }
   0x9   :  { %p328_p3 = scmp.ne.s32.totalorder %s23_s16, %s327_s24  ;;  %p333_p5 = scmp.lt.s32.totalorder %s327_s24, %s327_s24 }
   0xb   :  { %p334_p6 = por %p333_p5, %p332_p4 }
   0xd   :  { %p335_p7 = pnand %p334_p6, %p328_p3 }
   0xf   :  { %338 = shalt.err (!%p335_p7)
}
  0x10   :  { %s366_s25 = smov 128   ;;  %s367_s26 = smov 8  }
  0x11   :  { %28 = dma.hbm_to_vmem [thread:$0]  %s458_s3, 256, %s23_s16, [#allocation3], %s366_s25, %s366_s25, %s367_s26  }
  0x12   :  { %361 = dma.done.wait [#allocation3], 256  }
  0x13   :  { %362 = vsyncadd [#allocation3], 4294967040  ;;  %v368_v0 = vmov 0   ;;  %v33_v1 = vld [vmem:[%s455_s0 + $0x8] sm:$0xff]  ;;  %v32_v2 = vld [vmem:[%s455_s0] sm:$0xff]  ;;  %vm75_vm0 = vcmask 1040384   ;;  %v36_v14 = vlaneseq }
  0x14   :  { %316 = vset.pattern.permute.xlu1 %v368_v0  ;;  %315 = vset.pattern.permute.xlu0 %v368_v0  ;;  %v35_v3 = vld [vmem:[%s456_s1 + $0x8] sm:$0xff]  ;;  %v34_v4 = vld [vmem:[%s456_s1] sm:$0xff]  ;;  %v64_v8 = vld [vmem:[%s457_s2 + $0x10] sm:$0xff]  ;;  %vm369_vm1 = vmmov 1   ;;  %vm154_vm3 = vcmask 261120   ;;  %v370_v18 = vmov 0.0  }
  0x15   :  { %42 = vperm.xlu1 %316, %v33_v1   ;;  %39 = vperm.xlu0 %315, %v32_v2   ;;  %v62_v5 = vld [vmem:[%s457_s2] sm:$0xff]  ;;  %v63_v6 = vld [vmem:[%s457_s2 + $0x8] sm:$0xff]  ;;  %v65_v9 = vld [vmem:[%s457_s2 + $0x18] sm:$0xff]  ;;  %v37_v15 = vand.u32 127, %v36_v14  ;;  %vm68_vm6 = vcmask 72704   ;;  %s371_s1 = smov [#allocation5]  }
  0x16   :  { %v298_v7 = vpack.c.bf16 %v63_v6, %v62_v5  ;;  %v66_v10 = vld [vmem:[#allocation2] sm:$0xff]  ;;  %v302_v11 = vpack.c.bf16 %v65_v9, %v64_v8  ;;  %v67_v12 = vld [vmem:[#allocation2 + $0x8] sm:$0x1]  ;;  %vm293_vm2 = vmpackc.low %vm75_vm0, %vm369_vm1  ;;  %s243_s2 = sshll.u32 %s371_s1, 4  ;;  %s244_s2 = int_to_ptr.vmem [resolvable:$true] %s243_s2 }
  0x17   :  { %v292_v13 = vpack.c.bf16 %v67_v12, %v66_v10  ;;  %s339_s17 = scalar_lea.vmem %s244_s2, 256  ;;  %p344_p9 = scmp.lt.s32.totalorder %s244_s2, %s244_s2 }
  0x18   :  { %299 = vmatprep.subr.bf16.mxu0 %v298_v7  ;;  %p340_p8 = scmp.ne.s32.totalorder %s244_s2, %s339_s17  ;;  %p345_p10 = scmp.lt.s32.totalorder %s339_s17, %s339_s17 }
  0x19   :  { %54 = vperm.xlu1 %316, %v35_v3   ;;  %51 = vperm.xlu0 %315, %v34_v4  }
  0x1a   :  { %301 = vmatpush3.bf16.msra.mxu0 %v298_v7  ;;  %294 = vmatprep.subr.msk.bf16.mxu1 %vm293_vm2, %v292_v13  ;;  %p346_p11 = por %p345_p10, %p344_p9 }
  0x1b   :  { %303 = vmatprep.subr.bf16.mxu0 %v302_v11  ;;  %297 = vmatpush3.bf16.msk.msra.mxu1 %vm293_vm2, %v292_v13 }
  0x1c   :  { %p347_p12 = pnand %p346_p11, %p340_p8 }
  0x1e   :  { %305 = vmatpush3.bf16.msra.mxu0 %v302_v11 }
  0x94   :  { %v43_v16 = vpop.permute.xlu1 %42  ;;  %v40_v17 = vpop.permute.xlu0 %39 }
  0x95   :  { %vm45_vm4 = vcmp.eq.s32.totalorder %v37_v15, %v43_v16  ;;  %vm44_vm5 = vcmp.eq.s32.totalorder %v37_v15, %v40_v17 }
  0x96   :  { %v256_v19 = vsel %vm45_vm4, 1.0, %v370_v18  ;;  %v255_v20 = vsel %vm44_vm5, 1.0, %v370_v18 }
  0x97   :  { %289 = vmatprep.mubr.msk.f32.mxu0 %vm154_vm3, %v255_v20 }
  0x98   :  { %v55_v21 = vpop.permute.xlu1 %54  ;;  %290 = vmatmul.mubr.msk.f32.vlgmr.msra.gmra.mrb[0].mxu0 %vm154_vm3, %v256_v19  ;;  %v52_v22 = vpop.permute.xlu0 %51 }
  0x99   :  { %vm57_vm7 = vcmp.eq.s32.totalorder %v37_v15, %v55_v21  ;;  %vm56_vm8 = vcmp.eq.s32.totalorder %v37_v15, %v52_v22 }
  0x9a   :  { %v258_v23 = vsel %vm57_vm7, 1.0, %v370_v18  ;;  %v257_v24 = vsel %vm56_vm8, 1.0, %v370_v18 }
  0x9b   :  { %278 = vmatprep.mubr.msk.f32.mxu1 %vm68_vm6, %v257_v24 }
  0x9c   :  { %279 = vmatmul.mubr.msk.f32.vlgmr.msra.gmra.mrb[0].mxu1 %vm68_vm6, %v258_v23 }
 0x16b   :  { %v291_v25 = vpop.f32.mrb[0].mxu0 }
 0x16c   :  { %v227_v26 = vpop.f32.mrb[1].mxu0 }
 0x16f   :  { %v280_v27 = vpop.f32.mrb[0].mxu1 }
 0x170   :  { %v233_v28 = vadd.f32 %v291_v25, %v280_v27  ;;  %v145_v29 = vpop.f32.mrb[1].mxu1 }
 0x171   :  { %v228_v30 = vadd.f32 %v227_v26, %v145_v29 }
 0x172   :  { %237 = vst.msk [vmem:[#allocation5 + $0x8] sm:$0xff] %vm154_vm3, %v233_v28 }
 0x173   :  { %236 = vst.msk [vmem:[#allocation5] sm:$0xff] %vm154_vm3, %v228_v30 }
 0x174   :  { %350 = shalt.err (!%p347_p12)
}
 0x175   :  { %s351_s20 = scalar_lea.hbm %s459_s4, 256 }
 0x176   :  { %p352_p13 = scmp.ne.s32.totalorder %s459_s4, %s351_s20  ;;  %p355_p0 = scmp.lt.u32.totalorder %s351_s20, %s459_s4 }
 0x178   :  { %p357_p1 = pnand %p355_p0, %p352_p13 }
 0x17a   :  { %360 = shalt.err (!%p357_p1)
}
 0x17b   :  { %249 = dma.vmem_to_hbm [thread:$0]  %s244_s2, 256, %s459_s4, [#allocation4], %s366_s25, %s366_s25, %s367_s26  }
 0x17c   :  { %363 = dma.done.wait [#allocation4], 256  }
 0x17d   :  { %364 = vsyncadd [#allocation4], 4294967040 }
 0x17e   :  { %253 = vsyncpa [#allocation3], 1 }
 0x17f   :  { %254 = vsyncpa [#allocation4], 1 }

</bundles_post_ra>
